<compile_context>
chip_gen: v6e
topology: v6e:2x2x1
jax: 0.10.0
libtpu: 0.0.40
codegen_flags: <defaults>
</compile_context>

<pallas_src>
import math
import jax
import jax.numpy as jnp
from jax.experimental import pallas as pl
from jax.experimental.pallas import tpu as pltpu


# ----------------------------------------------------------------------------- #
# Fused Pallas kernel: grid = (num_layers, num_edge_tiles)
# ----------------------------------------------------------------------------- #
def _mpnn_fused_kernel(
    src_ref, dst_ref, nf0_ref, ef0_ref,
    we_e_ref, we_s_ref, we_d_ref, be1_ref, we2_ref, be2_ref,
    wn_n_ref, wn_a_ref, bn1_ref, wn2_ref, bn2_ref,
    nf_out_ref, ef_out_ref,
    nf_buf, ef_buf, acc_ref,
):
    l = pl.program_id(0)                      # layer index (outer, sequential)
    e = pl.program_id(1)                      # edge-tile index (inner, sequential)
    tile_e = ef0_ref.shape[0]
    n_pad = nf_buf.shape[0]
    row0 = pl.multiple_of(e * tile_e, 8)

    # One-time load of node features into the resident VMEM buffer.
    @pl.when(jnp.logical_and(l == 0, e == 0))
    def _():
        nf_buf[...] = nf0_ref[...]

    # Layer 0 reads external edge features; later layers read the previous layer's
    # output already sitting in VMEM.
    @pl.when(l == 0)
    def _():
        ef_buf[pl.ds(row0, tile_e), :] = ef0_ref[...]

    # Zero the per-node aggregation accumulator at the start of every layer.
    @pl.when(e == 0)
    def _():
        acc_ref[...] = jnp.zeros_like(acc_ref)

    nf = nf_buf[...]                                   # (N_pad, NF)
    ef = ef_buf[pl.ds(row0, tile_e), :]                # (tile_E, EF)

    # Build gather/scatter one-hot masks on-chip from the int32 edge endpoints
    # (padded edges carry the sentinel index n_pad -> all-zero rows -> no effect).
    node_ids = jax.lax.broadcasted_iota(jnp.int32, (tile_e, n_pad), 1)
    oh_src = (node_ids == src_ref[...]).astype(jnp.float32)      # (tile_E, N_pad)
    oh_dst = (node_ids == dst_ref[...]).astype(jnp.float32)      # (tile_E, N_pad)

    src_h = jnp.dot(oh_src, nf, preferred_element_type=jnp.float32)   # (tile_E, NF)
    dst_h = jnp.dot(oh_dst, nf, preferred_element_type=jnp.float32)   # (tile_E, NF)

    # Edge MLP on concat([ef, nf[src], nf[dst]]) via split weights.
    h_e = (jnp.dot(ef, we_e_ref[0], preferred_element_type=jnp.float32)
           + jnp.dot(src_h, we_s_ref[0], preferred_element_type=jnp.float32)
           + jnp.dot(dst_h, we_d_ref[0], preferred_element_type=jnp.float32)
           + be1_ref[0])
    h_e = jnp.maximum(h_e, 0.0)
    ef_new = jnp.dot(h_e, we2_ref[0], preferred_element_type=jnp.float32) + be2_ref[0]

    ef_buf[pl.ds(row0, tile_e), :] = ef_new            # carry to next layer (VMEM)
    ef_out_ref[...] = ef_new                           # HBM output (last layer wins)

    # Scatter-add into the per-node accumulator: acc += one_hot(dst)^T @ ef_new.
    acc_ref[...] += jax.lax.dot_general(
        oh_dst, ef_new, (((0,), (0,)), ((), ())),
        preferred_element_type=jnp.float32)

    # Node MLP once all edge tiles of this layer have been aggregated.
    @pl.when(e == pl.num_programs(1) - 1)
    def _():
        agg = acc_ref[...]
        h_n = (jnp.dot(nf, wn_n_ref[0], preferred_element_type=jnp.float32)
               + jnp.dot(agg, wn_a_ref[0], preferred_element_type=jnp.float32)
               + bn1_ref[0])
        h_n = jnp.maximum(h_n, 0.0)
        nf_new = jnp.dot(h_n, wn2_ref[0], preferred_element_type=jnp.float32) + bn2_ref[0]
        nf_buf[...] = nf_new
        nf_out_ref[...] = nf_new


# ----------------------------------------------------------------------------- #
# Wrapper: pad / stack per-layer weights, build specs, single pallas_call
# ----------------------------------------------------------------------------- #
def _round_up(x, m):
    return ((x + m - 1) // m) * m


_WEIGHT_ORDER = ("we_e", "we_s", "we_d", "be1", "we2", "be2",
                 "wn_n", "wn_a", "bn1", "wn2", "bn2")


def mpnn_forward(params_list, src, dst, nf, ef, num_nodes, tile_e=256):
    num_layers = len(params_list)
    N = int(num_nodes)
    E = int(src.shape[0])
    H = int(params_list[0]["be1"].shape[1])
    assert all(int(p["be1"].shape[1]) == H for p in params_list)

    node_dims = [int(nf.shape[1])] + [int(p["wn2"].shape[1]) for p in params_list]
    edge_dims = [int(ef.shape[1])] + [int(p["we2"].shape[1]) for p in params_list]
    nf_w = max(node_dims)                 # common (zero-padded) node-feature width
    ef_w = max(edge_dims)                 # common (zero-padded) edge-feature width

    n_pad = _round_up(max(N, 8), 8)
    tile_e = _round_up(min(tile_e, _round_up(E, 8)), 8)
    e_pad = _round_up(E, tile_e)
    n_tiles = e_pad // tile_e

    # ---- pad & stack per-layer weights to common shapes (zero padding is exact,
    #      because padded feature columns are kept exactly zero layer-to-layer) ----
    tgt = {"we_e": (ef_w, H), "we_s": (nf_w, H), "we_d": (nf_w, H), "be1": (1, H),
           "we2": (H, ef_w), "be2": (1, ef_w),
           "wn_n": (nf_w, H), "wn_a": (ef_w, H), "bn1": (1, H),
           "wn2": (H, nf_w), "bn2": (1, nf_w)}
    stacked = {}
    for name in _WEIGHT_ORDER:
        mats = []
        for p in params_list:
            w = p[name].astype(jnp.float32)
            pad = [(0, t - s) for s, t in zip(w.shape, tgt[name])]
            mats.append(jnp.pad(w, pad))
        stacked[name] = jnp.stack(mats, axis=0)        # (L, r, c)

    # ---- pad graph / features; sentinel index n_pad masks padded edges out ----
    nf_p = jnp.pad(nf.astype(jnp.float32),
                   ((0, n_pad - N), (0, nf_w - int(nf.shape[1]))))
    ef_p = jnp.pad(ef.astype(jnp.float32),
                   ((0, e_pad - E), (0, ef_w - int(ef.shape[1]))))
    src_p = jnp.pad(src.astype(jnp.int32), (0, e_pad - E),
                    constant_values=n_pad).reshape(e_pad, 1)
    dst_p = jnp.pad(dst.astype(jnp.int32), (0, e_pad - E),
                    constant_values=n_pad).reshape(e_pad, 1)

    # ---- BlockSpecs ----
    in_specs = [
        pl.BlockSpec((tile_e, 1), lambda l, e: (e, 0)),        # src
        pl.BlockSpec((tile_e, 1), lambda l, e: (e, 0)),        # dst
        pl.BlockSpec((n_pad, nf_w), lambda l, e: (0, 0)),      # nf (resident)
        pl.BlockSpec((tile_e, ef_w), lambda l, e: (e, 0)),     # ef (layer 0 input)
    ]
    for name in _WEIGHT_ORDER:                                 # per-layer weights
        r, c = tgt[name]
        in_specs.append(pl.BlockSpec((1, r, c), lambda l, e: (l, 0, 0)))

    out_shape = (jax.ShapeDtypeStruct((n_pad, nf_w), jnp.float32),
                 jax.ShapeDtypeStruct((e_pad, ef_w), jnp.float32))
    out_specs = (pl.BlockSpec((n_pad, nf_w), lambda l, e: (0, 0)),
                 pl.BlockSpec((tile_e, ef_w), lambda l, e: (e, 0)))

    scratch_shapes = [pltpu.VMEM((n_pad, nf_w), jnp.float32),   # nf_buf
                      pltpu.VMEM((e_pad, ef_w), jnp.float32),   # ef_buf
                      pltpu.VMEM((n_pad, ef_w), jnp.float32)]   # aggregation acc

    # ---- VMEM budget (cap at 64 MiB so it also fits v7x) + cost estimate ----
    f32 = 4
    w_bytes = sum(r * c for (r, c) in tgt.values()) * f32
    vmem_needed = f32 * (3 * n_pad * nf_w          # nf input + nf_buf + nf_out
                         + e_pad * ef_w            # ef_buf resident across layers
                         + n_pad * ef_w            # accumulator
                         + 4 * tile_e * ef_w       # ef in/out blocks (double-buffered)
                         + 4 * tile_e)             # src/dst blocks
    vmem_needed += 2 * w_bytes                     # double-buffered weight blocks
    vmem_limit = int(min(64 << 20, max(16 << 20, 2 * vmem_needed)))

    flops_layer = (2 * 2 * e_pad * n_pad * nf_w            # src/dst gathers
                   + 2 * e_pad * (ef_w + 2 * nf_w) * H     # edge MLP (first linear)
                   + 2 * e_pad * H * ef_w                  # edge MLP (second linear)
                   + 2 * e_pad * n_pad * ef_w              # scatter-add
                   + 2 * n_pad * (nf_w + ef_w) * H         # node MLP (first linear)
                   + 2 * n_pad * H * nf_w)                 # node MLP (second linear)
    bytes_accessed = (f32 * (2 * n_pad * nf_w
                             + e_pad * ef_w * (num_layers + 1)
                             + 2 * e_pad * num_layers)
                      + num_layers * w_bytes)
    cost = pl.CostEstimate(flops=int(num_layers * flops_layer),
                           transcendentals=0,
                           bytes_accessed=int(bytes_accessed))

    nf_out, ef_out = pl.pallas_call(
        _mpnn_fused_kernel,
        out_shape=out_shape,
        grid=(num_layers, n_tiles),
        in_specs=in_specs,
        out_specs=out_specs,
        scratch_shapes=scratch_shapes,
        compiler_params=pltpu.CompilerParams(
            dimension_semantics=("arbitrary", "arbitrary"),
            vmem_limit_bytes=vmem_limit),
        cost_estimate=cost,
    )(src_p, dst_p, nf_p, ef_p, *[stacked[name] for name in _WEIGHT_ORDER])

    return nf_out[:N, :node_dims[-1]], ef_out[:E, :edge_dims[-1]]


# ----------------------------------------------------------------------------- #
# Parameter construction (deterministic, PyTorch nn.Linear-style uniform init)
# ----------------------------------------------------------------------------- #
def _linear_init(key, fan_in, fan_out):
    kw, kb = jax.random.split(key)
    bound = 1.0 / math.sqrt(fan_in)
    w = jax.random.uniform(kw, (fan_in, fan_out), jnp.float32, -bound, bound)
    b = jax.random.uniform(kb, (1, fan_out), jnp.float32, -bound, bound)
    return w, b


def make_layer_params(key, node_in, node_out, edge_in, edge_out, mlp_hidden):
    k1, k2, k3, k4 = jax.random.split(key, 4)
    # edge MLP: (edge_in + 2*node_in) -> mlp_hidden -> edge_out
    we1, be1 = _linear_init(k1, edge_in + 2 * node_in, mlp_hidden)
    we2, be2 = _linear_init(k2, mlp_hidden, edge_out)
    # node MLP: (node_in + edge_out) -> mlp_hidden -> node_out
    wn1, bn1 = _linear_init(k3, node_in + edge_out, mlp_hidden)
    wn2, bn2 = _linear_init(k4, mlp_hidden, node_out)
    return {
        "we_e": we1[:edge_in],
        "we_s": we1[edge_in:edge_in + node_in],
        "we_d": we1[edge_in + node_in:],
        "be1": be1, "we2": we2, "be2": be2,
        "wn_n": wn1[:node_in],
        "wn_a": wn1[node_in:],
        "bn1": bn1, "wn2": wn2, "bn2": bn2,
    }


def make_mpnn_params(key, node_in_dim, edge_in_dim,
                     node_hidden_dim=64, edge_hidden_dim=64,
                     node_out_dim=64, edge_out_dim=64,
                     num_hidden_gn=0, mlp_hidden=32):
    node_in_dims = [node_in_dim] + num_hidden_gn * [node_hidden_dim]
    node_out_dims = num_hidden_gn * [node_hidden_dim] + [node_out_dim]
    edge_in_dims = [edge_in_dim] + num_hidden_gn * [edge_hidden_dim]
    edge_out_dims = num_hidden_gn * [edge_hidden_dim] + [edge_out_dim]
    keys = jax.random.split(key, len(node_in_dims))
    return [make_layer_params(k, ni, no, ei, eo, mlp_hidden)
            for k, ni, no, ei, eo in
            zip(keys, node_in_dims, node_out_dims, edge_in_dims, edge_out_dims)]


# pure-JAX reference (for correctness check only)
def mpnn_reference(params_list, src, dst, nf, ef, num_nodes):
    for p in params_list:
        src_h = nf[src]
        dst_h = nf[dst]
        h_e = jnp.maximum(ef @ p["we_e"] + src_h @ p["we_s"]
                          + dst_h @ p["we_d"] + p["be1"], 0.0)
        ef_new = h_e @ p["we2"] + p["be2"]
        agg = jnp.zeros((num_nodes, ef_new.shape[1]), jnp.float32).at[dst].add(ef_new)
        h_n = jnp.maximum(nf @ p["wn_n"] + agg @ p["wn_a"] + p["bn1"], 0.0)
        nf = h_n @ p["wn2"] + p["bn2"]
        ef = ef_new
    return nf, ef


if __name__ == "__main__":
    key = jax.random.PRNGKey(0)
    k_nf, k_ef, k_src, k_dst, k_params = jax.random.split(key, 5)

    # small graph: 8 nodes, 16 directed edges
    N, E = 8, 16
    NODE_IN, EDGE_IN = 4, 4
    NODE_OUT, EDGE_OUT = 64, 64
    NUM_HIDDEN_GN = 1          # -> 2 stacked MPNN layers
    MLP_HIDDEN = 32

    nf = jax.random.normal(k_nf, (N, NODE_IN), jnp.float32)
    ef = jax.random.normal(k_ef, (E, EDGE_IN), jnp.float32)
    src = jax.random.randint(k_src, (E,), 0, N)
    dst = jax.random.randint(k_dst, (E,), 0, N)

    params = make_mpnn_params(k_params, NODE_IN, EDGE_IN,
                              node_hidden_dim=64, edge_hidden_dim=64,
                              node_out_dim=NODE_OUT, edge_out_dim=EDGE_OUT,
                              num_hidden_gn=NUM_HIDDEN_GN, mlp_hidden=MLP_HIDDEN)

    nf_out, ef_out = mpnn_forward(params, src, dst, nf, ef, N)
    jax.block_until_ready((nf_out, ef_out))

    nf_ref, ef_ref = mpnn_reference(params, src, dst, nf, ef, N)
    assert nf_out.shape == (N, NODE_OUT) and ef_out.shape == (E, EDGE_OUT)
    assert jnp.allclose(nf_out, nf_ref, atol=1e-4, rtol=1e-4)
    assert jnp.allclose(ef_out, ef_ref, atol=1e-4, rtol=1e-4)

    print("KERNEL_OK")
</pallas_src>

<mosaic_0001>
module attributes {stable_mosaic.version = 11 : i64} {
  func.func @_mpnn_fused_kernel(%arg0: i32, %arg1: i32, %arg2: memref<16x1xi32, #tpu.memory_space<vmem>>, %arg3: memref<16x1xi32, #tpu.memory_space<vmem>>, %arg4: memref<8x64xf32, #tpu.memory_space<vmem>>, %arg5: memref<16x64xf32, #tpu.memory_space<vmem>>, %arg6: memref<1x64x32xf32, #tpu.memory_space<vmem>>, %arg7: memref<1x64x32xf32, #tpu.memory_space<vmem>>, %arg8: memref<1x64x32xf32, #tpu.memory_space<vmem>>, %arg9: memref<1x1x32xf32, #tpu.memory_space<vmem>>, %arg10: memref<1x32x64xf32, #tpu.memory_space<vmem>>, %arg11: memref<1x1x64xf32, #tpu.memory_space<vmem>>, %arg12: memref<1x64x32xf32, #tpu.memory_space<vmem>>, %arg13: memref<1x64x32xf32, #tpu.memory_space<vmem>>, %arg14: memref<1x1x32xf32, #tpu.memory_space<vmem>>, %arg15: memref<1x32x64xf32, #tpu.memory_space<vmem>>, %arg16: memref<1x1x64xf32, #tpu.memory_space<vmem>>, %arg17: memref<8x64xf32, #tpu.memory_space<vmem>>, %arg18: memref<16x64xf32, #tpu.memory_space<vmem>>, %arg19: memref<8x64xf32, #tpu.memory_space<vmem>>, %arg20: memref<16x64xf32, #tpu.memory_space<vmem>>, %arg21: memref<8x64xf32, #tpu.memory_space<vmem>>) attributes {dimension_semantics = [#tpu.dimension_semantics<arbitrary>, #tpu.dimension_semantics<arbitrary>], iteration_bounds = array<i64: 2, 1>, scalar_prefetch = 0 : i64, scratch_operands = 3 : i64, tpu.core_type = #tpu.core_type<tc>, window_params = [{transform_indices = @transform_0, window_bounds = array<i64: 16, 1>}, {transform_indices = @transform_1, window_bounds = array<i64: 16, 1>}, {pipeline_mode = #tpu.pipeline_mode<synchronous>, transform_indices = @transform_2, window_bounds = array<i64: 8, 64>}, {transform_indices = @transform_3, window_bounds = array<i64: 16, 64>}, {transform_indices = @transform_4, window_bounds = array<i64: 1, 64, 32>}, {transform_indices = @transform_5, window_bounds = array<i64: 1, 64, 32>}, {transform_indices = @transform_6, window_bounds = array<i64: 1, 64, 32>}, {transform_indices = @transform_7, window_bounds = array<i64: 1, 1, 32>}, {transform_indices = @transform_8, window_bounds = array<i64: 1, 32, 64>}, {transform_indices = @transform_9, window_bounds = array<i64: 1, 1, 64>}, {transform_indices = @transform_10, window_bounds = array<i64: 1, 64, 32>}, {transform_indices = @transform_11, window_bounds = array<i64: 1, 64, 32>}, {transform_indices = @transform_12, window_bounds = array<i64: 1, 1, 32>}, {transform_indices = @transform_13, window_bounds = array<i64: 1, 32, 64>}, {transform_indices = @transform_14, window_bounds = array<i64: 1, 1, 64>}, {pipeline_mode = #tpu.pipeline_mode<synchronous>, transform_indices = @transform_15, window_bounds = array<i64: 8, 64>}, {transform_indices = @transform_16, window_bounds = array<i64: 16, 64>}]} {
    %c16_i32 = arith.constant 16 : i32
    %0 = arith.muli %arg1, %c16_i32 : i32
    %1 = tpu.assume_multiple %0, 8 : i32
    %c0_i32 = arith.constant 0 : i32
    %2 = arith.cmpi eq, %arg0, %c0_i32 : i32
    %c0_i32_0 = arith.constant 0 : i32
    %3 = arith.cmpi eq, %arg1, %c0_i32_0 : i32
    %4 = arith.andi %2, %3 : i1
    %5 = arith.extui %4 : i1 to i32
    %c0_i32_1 = arith.constant 0 : i32
    %6 = arith.cmpi ne, %5, %c0_i32_1 : i32
    scf.if %6 {
      %c0_46 = arith.constant 0 : index
      %c0_47 = arith.constant 0 : index
      %63 = vector.load %arg4[%c0_46, %c0_47] : memref<8x64xf32, #tpu.memory_space<vmem>>, vector<8x64xf32>
      %c0_48 = arith.constant 0 : index
      %c0_49 = arith.constant 0 : index
      %64 = vector.load %arg19[%c0_48, %c0_49] : memref<8x64xf32, #tpu.memory_space<vmem>>, vector<8x64xf32>
      tpu.vector_store %arg19[%c0_48, %c0_49], %63 {strides = array<i32>} : memref<8x64xf32, #tpu.memory_space<vmem>>, vector<8x64xf32>,
    } else {
    }
    %c0_i32_2 = arith.constant 0 : i32
    %7 = arith.cmpi eq, %arg0, %c0_i32_2 : i32
    %8 = arith.extui %7 : i1 to i32
    %c0_i32_3 = arith.constant 0 : i32
    %9 = arith.cmpi ne, %8, %c0_i32_3 : i32
    scf.if %9 {
      %c0_46 = arith.constant 0 : index
      %c0_47 = arith.constant 0 : index
      %63 = vector.load %arg5[%c0_46, %c0_47] : memref<16x64xf32, #tpu.memory_space<vmem>>, vector<16x64xf32>
      %64 = arith.index_cast %1 : i32 to index
      %c0_48 = arith.constant 0 : index
      %65 = vector.load %arg20[%64, %c0_48] : memref<16x64xf32, #tpu.memory_space<vmem>>, vector<16x64xf32>
      tpu.vector_store %arg20[%64, %c0_48], %63 {strides = array<i32>} : memref<16x64xf32, #tpu.memory_space<vmem>>, vector<16x64xf32>,
    } else {
    }
    %c0_i32_4 = arith.constant 0 : i32
    %10 = arith.cmpi eq, %arg1, %c0_i32_4 : i32
    %11 = arith.extui %10 : i1 to i32
    %c0_i32_5 = arith.constant 0 : i32
    %12 = arith.cmpi ne, %11, %c0_i32_5 : i32
    scf.if %12 {
      %cst_46 = arith.constant 0.000000e+00 : f32
      %63 = vector.broadcast %cst_46 : f32 to vector<8x64xf32>
      %c0_47 = arith.constant 0 : index
      %c0_48 = arith.constant 0 : index
      %64 = vector.load %arg21[%c0_47, %c0_48] : memref<8x64xf32, #tpu.memory_space<vmem>>, vector<8x64xf32>
      tpu.vector_store %arg21[%c0_47, %c0_48], %63 {strides = array<i32>} : memref<8x64xf32, #tpu.memory_space<vmem>>, vector<8x64xf32>,
    } else {
    }
    %c0 = arith.constant 0 : index
    %c0_6 = arith.constant 0 : index
    %13 = vector.load %arg19[%c0, %c0_6] : memref<8x64xf32, #tpu.memory_space<vmem>>, vector<8x64xf32>
    %14 = arith.index_cast %1 : i32 to index
    %c0_7 = arith.constant 0 : index
    %15 = vector.load %arg20[%14, %c0_7] : memref<16x64xf32, #tpu.memory_space<vmem>>, vector<16x64xf32>
    %16 = tpu.iota {dimensions = array<i32: 1>} : vector<16x8xi32>
    %c0_8 = arith.constant 0 : index
    %c0_9 = arith.constant 0 : index
    %17 = vector.load %arg2[%c0_8, %c0_9] : memref<16x1xi32, #tpu.memory_space<vmem>>, vector<16x1xi32>
    %18 = vector.broadcast %17 : vector<16x1xi32> to vector<16x8xi32>
    %19 = arith.cmpi eq, %16, %18 : vector<16x8xi32>
    %20 = arith.extui %19 : vector<16x8xi1> to vector<16x8xi32>
    %21 = arith.sitofp %20 : vector<16x8xi32> to vector<16x8xf32>
    %c0_10 = arith.constant 0 : index
    %c0_11 = arith.constant 0 : index
    %22 = vector.load %arg3[%c0_10, %c0_11] : memref<16x1xi32, #tpu.memory_space<vmem>>, vector<16x1xi32>
    %23 = vector.broadcast %22 : vector<16x1xi32> to vector<16x8xi32>
    %24 = arith.cmpi eq, %16, %23 : vector<16x8xi32>
    %25 = arith.extui %24 : vector<16x8xi1> to vector<16x8xi32>
    %26 = arith.sitofp %25 : vector<16x8xi32> to vector<16x8xf32>
    %cst = arith.constant dense<0.000000e+00> : vector<16x64xf32>
    %27 = tpu.matmul %21, %13, %cst {dimension_numbers = #tpu.dot_dimension_numbers<[1], [0], [0], [1], [0, 0, 1, 1], [], []>} : vector<16x8xf32>, vector<8x64xf32>, vector<16x64xf32> -> vector<16x64xf32>
    %cst_12 = arith.constant dense<0.000000e+00> : vector<16x64xf32>
    %28 = tpu.matmul %26, %13, %cst_12 {dimension_numbers = #tpu.dot_dimension_numbers<[1], [0], [0], [1], [0, 0, 1, 1], [], []>} : vector<16x8xf32>, vector<8x64xf32>, vector<16x64xf32> -> vector<16x64xf32>
    %c0_13 = arith.constant 0 : index
    %c0_14 = arith.constant 0 : index
    %c0_15 = arith.constant 0 : index
    %29 = vector.load %arg6[%c0_13, %c0_14, %c0_15] : memref<1x64x32xf32, #tpu.memory_space<vmem>>, vector<1x64x32xf32>
    %30 = vector.shape_cast %29 : vector<1x64x32xf32> to vector<64x32xf32>
    %cst_16 = arith.constant dense<0.000000e+00> : vector<16x32xf32>
    %31 = tpu.matmul %15, %30, %cst_16 {dimension_numbers = #tpu.dot_dimension_numbers<[1], [0], [0], [1], [0, 0, 1, 1], [], []>} : vector<16x64xf32>, vector<64x32xf32>, vector<16x32xf32> -> vector<16x32xf32>
    %c0_17 = arith.constant 0 : index
    %c0_18 = arith.constant 0 : index
    %c0_19 = arith.constant 0 : index
    %32 = vector.load %arg7[%c0_17, %c0_18, %c0_19] : memref<1x64x32xf32, #tpu.memory_space<vmem>>, vector<1x64x32xf32>
    %33 = vector.shape_cast %32 : vector<1x64x32xf32> to vector<64x32xf32>
    %cst_20 = arith.constant dense<0.000000e+00> : vector<16x32xf32>
    %34 = tpu.matmul %27, %33, %cst_20 {dimension_numbers = #tpu.dot_dimension_numbers<[1], [0], [0], [1], [0, 0, 1, 1], [], []>} : vector<16x64xf32>, vector<64x32xf32>, vector<16x32xf32> -> vector<16x32xf32>
    %35 = arith.addf %31, %34 : vector<16x32xf32>
    %c0_21 = arith.constant 0 : index
    %c0_22 = arith.constant 0 : index
    %c0_23 = arith.constant 0 : index
    %36 = vector.load %arg8[%c0_21, %c0_22, %c0_23] : memref<1x64x32xf32, #tpu.memory_space<vmem>>, vector<1x64x32xf32>
    %37 = vector.shape_cast %36 : vector<1x64x32xf32> to vector<64x32xf32>
    %cst_24 = arith.constant dense<0.000000e+00> : vector<16x32xf32>
    %38 = tpu.matmul %28, %37, %cst_24 {dimension_numbers = #tpu.dot_dimension_numbers<[1], [0], [0], [1], [0, 0, 1, 1], [], []>} : vector<16x64xf32>, vector<64x32xf32>, vector<16x32xf32> -> vector<16x32xf32>
    %39 = arith.addf %35, %38 : vector<16x32xf32>
    %c0_25 = arith.constant 0 : index
    %c0_26 = arith.constant 0 : index
    %c0_27 = arith.constant 0 : index
    %40 = vector.load %arg9[%c0_25, %c0_26, %c0_27] : memref<1x1x32xf32, #tpu.memory_space<vmem>>, vector<1x1x32xf32>
    %41 = vector.shape_cast %40 : vector<1x1x32xf32> to vector<1x32xf32>
    %42 = vector.broadcast %41 : vector<1x32xf32> to vector<16x32xf32>
    %43 = arith.addf %39, %42 : vector<16x32xf32>
    %cst_28 = arith.constant 0.000000e+00 : f32
    %44 = vector.broadcast %cst_28 : f32 to vector<16x32xf32>
    %45 = arith.maximumf %43, %44 : vector<16x32xf32>
    %c0_29 = arith.constant 0 : index
    %c0_30 = arith.constant 0 : index
    %c0_31 = arith.constant 0 : index
    %46 = vector.load %arg10[%c0_29, %c0_30, %c0_31] : memref<1x32x64xf32, #tpu.memory_space<vmem>>, vector<1x32x64xf32>
    %47 = vector.shape_cast %46 : vector<1x32x64xf32> to vector<32x64xf32>
    %cst_32 = arith.constant dense<0.000000e+00> : vector<16x64xf32>
    %48 = tpu.matmul %45, %47, %cst_32 {dimension_numbers = #tpu.dot_dimension_numbers<[1], [0], [0], [1], [0, 0, 1, 1], [], []>} : vector<16x32xf32>, vector<32x64xf32>, vector<16x64xf32> -> vector<16x64xf32>
    %c0_33 = arith.constant 0 : index
    %c0_34 = arith.constant 0 : index
    %c0_35 = arith.constant 0 : index
    %49 = vector.load %arg11[%c0_33, %c0_34, %c0_35] : memref<1x1x64xf32, #tpu.memory_space<vmem>>, vector<1x1x64xf32>
    %50 = vector.shape_cast %49 : vector<1x1x64xf32> to vector<1x64xf32>
    %51 = vector.broadcast %50 : vector<1x64xf32> to vector<16x64xf32>
    %52 = arith.addf %48, %51 : vector<16x64xf32>
    %53 = arith.index_cast %1 : i32 to index
    %c0_36 = arith.constant 0 : index
    %54 = vector.load %arg20[%53, %c0_36] : memref<16x64xf32, #tpu.memory_space<vmem>>, vector<16x64xf32>
    tpu.vector_store %arg20[%53, %c0_36], %52 {strides = array<i32>} : memref<16x64xf32, #tpu.memory_space<vmem>>, vector<16x64xf32>,
    %c0_37 = arith.constant 0 : index
    %c0_38 = arith.constant 0 : index
    %55 = vector.load %arg18[%c0_37, %c0_38] : memref<16x64xf32, #tpu.memory_space<vmem>>, vector<16x64xf32>
    tpu.vector_store %arg18[%c0_37, %c0_38], %52 {strides = array<i32>} : memref<16x64xf32, #tpu.memory_space<vmem>>, vector<16x64xf32>,
    %c0_39 = arith.constant 0 : index
    %c0_40 = arith.constant 0 : index
    %56 = vector.load %arg21[%c0_39, %c0_40] : memref<8x64xf32, #tpu.memory_space<vmem>>, vector<8x64xf32>
    %cst_41 = arith.constant dense<0.000000e+00> : vector<8x64xf32>
    %57 = tpu.matmul %26, %52, %cst_41 {dimension_numbers = #tpu.dot_dimension_numbers<[0], [0], [1], [1], [0, 1, 1, 1], [], []>} : vector<16x8xf32>, vector<16x64xf32>, vector<8x64xf32> -> vector<8x64xf32>
    %58 = arith.addf %56, %57 : vector<8x64xf32>
    %c0_42 = arith.constant 0 : index
    %c0_43 = arith.constant 0 : index
    %59 = vector.load %arg21[%c0_42, %c0_43] : memref<8x64xf32, #tpu.memory_space<vmem>>, vector<8x64xf32>
    tpu.vector_store %arg21[%c0_42, %c0_43], %58 {strides = array<i32>} : memref<8x64xf32, #tpu.memory_space<vmem>>, vector<8x64xf32>,
    %c0_i32_44 = arith.constant 0 : i32
    %60 = arith.cmpi eq, %arg1, %c0_i32_44 : i32
    %61 = arith.extui %60 : i1 to i32
    %c0_i32_45 = arith.constant 0 : i32
    %62 = arith.cmpi ne, %61, %c0_i32_45 : i32
    scf.if %62 {
      %c0_46 = arith.constant 0 : index
      %c0_47 = arith.constant 0 : index
      %63 = vector.load %arg21[%c0_46, %c0_47] : memref<8x64xf32, #tpu.memory_space<vmem>>, vector<8x64xf32>
      %c0_48 = arith.constant 0 : index
      %c0_49 = arith.constant 0 : index
      %c0_50 = arith.constant 0 : index
      %64 = vector.load %arg12[%c0_48, %c0_49, %c0_50] : memref<1x64x32xf32, #tpu.memory_space<vmem>>, vector<1x64x32xf32>
      %65 = vector.shape_cast %64 : vector<1x64x32xf32> to vector<64x32xf32>
      %cst_51 = arith.constant dense<0.000000e+00> : vector<8x32xf32>
      %66 = tpu.matmul %13, %65, %cst_51 {dimension_numbers = #tpu.dot_dimension_numbers<[1], [0], [0], [1], [0, 0, 1, 1], [], []>} : vector<8x64xf32>, vector<64x32xf32>, vector<8x32xf32> -> vector<8x32xf32>
      %c0_52 = arith.constant 0 : index
      %c0_53 = arith.constant 0 : index
      %c0_54 = arith.constant 0 : index
      %67 = vector.load %arg13[%c0_52, %c0_53, %c0_54] : memref<1x64x32xf32, #tpu.memory_space<vmem>>, vector<1x64x32xf32>
      %68 = vector.shape_cast %67 : vector<1x64x32xf32> to vector<64x32xf32>
      %cst_55 = arith.constant dense<0.000000e+00> : vector<8x32xf32>
      %69 = tpu.matmul %63, %68, %cst_55 {dimension_numbers = #tpu.dot_dimension_numbers<[1], [0], [0], [1], [0, 0, 1, 1], [], []>} : vector<8x64xf32>, vector<64x32xf32>, vector<8x32xf32> -> vector<8x32xf32>
      %70 = arith.addf %66, %69 : vector<8x32xf32>
      %c0_56 = arith.constant 0 : index
      %c0_57 = arith.constant 0 : index
      %c0_58 = arith.constant 0 : index
      %71 = vector.load %arg14[%c0_56, %c0_57, %c0_58] : memref<1x1x32xf32, #tpu.memory_space<vmem>>, vector<1x1x32xf32>
      %72 = vector.shape_cast %71 : vector<1x1x32xf32> to vector<1x32xf32>
      %73 = vector.broadcast %72 : vector<1x32xf32> to vector<8x32xf32>
      %74 = arith.addf %70, %73 : vector<8x32xf32>
      %cst_59 = arith.constant 0.000000e+00 : f32
      %75 = vector.broadcast %cst_59 : f32 to vector<8x32xf32>
      %76 = arith.maximumf %74, %75 : vector<8x32xf32>
      %c0_60 = arith.constant 0 : index
      %c0_61 = arith.constant 0 : index
      %c0_62 = arith.constant 0 : index
      %77 = vector.load %arg15[%c0_60, %c0_61, %c0_62] : memref<1x32x64xf32, #tpu.memory_space<vmem>>, vector<1x32x64xf32>
      %78 = vector.shape_cast %77 : vector<1x32x64xf32> to vector<32x64xf32>
      %cst_63 = arith.constant dense<0.000000e+00> : vector<8x64xf32>
      %79 = tpu.matmul %76, %78, %cst_63 {dimension_numbers = #tpu.dot_dimension_numbers<[1], [0], [0], [1], [0, 0, 1, 1], [], []>} : vector<8x32xf32>, vector<32x64xf32>, vector<8x64xf32> -> vector<8x64xf32>
      %c0_64 = arith.constant 0 : index
      %c0_65 = arith.constant 0 : index
      %c0_66 = arith.constant 0 : index
      %80 = vector.load %arg16[%c0_64, %c0_65, %c0_66] : memref<1x1x64xf32, #tpu.memory_space<vmem>>, vector<1x1x64xf32>
      %81 = vector.shape_cast %80 : vector<1x1x64xf32> to vector<1x64xf32>
      %82 = vector.broadcast %81 : vector<1x64xf32> to vector<8x64xf32>
      %83 = arith.addf %79, %82 : vector<8x64xf32>
      %c0_67 = arith.constant 0 : index
      %c0_68 = arith.constant 0 : index
      %84 = vector.load %arg19[%c0_67, %c0_68] : memref<8x64xf32, #tpu.memory_space<vmem>>, vector<8x64xf32>
      tpu.vector_store %arg19[%c0_67, %c0_68], %83 {strides = array<i32>} : memref<8x64xf32, #tpu.memory_space<vmem>>, vector<8x64xf32>,
      %c0_69 = arith.constant 0 : index
      %c0_70 = arith.constant 0 : index
      %85 = vector.load %arg17[%c0_69, %c0_70] : memref<8x64xf32, #tpu.memory_space<vmem>>, vector<8x64xf32>
      tpu.vector_store %arg17[%c0_69, %c0_70], %83 {strides = array<i32>} : memref<8x64xf32, #tpu.memory_space<vmem>>, vector<8x64xf32>,
    } else {
    }
    return
  }
  func.func @transform_0(%arg0: i32, %arg1: i32) -> (i32, i32) {
    %c0_i32 = arith.constant 0 : i32
    %c0_i32_0 = arith.constant 0 : i32
    return %arg1, %c0_i32 : i32, i32
  }
  func.func @transform_1(%arg0: i32, %arg1: i32) -> (i32, i32) {
    %c0_i32 = arith.constant 0 : i32
    %c0_i32_0 = arith.constant 0 : i32
    return %arg1, %c0_i32 : i32, i32
  }
  func.func @transform_2(%arg0: i32, %arg1: i32) -> (i32, i32) {
    %c0_i32 = arith.constant 0 : i32
    %c0_i32_0 = arith.constant 0 : i32
    %c0_i32_1 = arith.constant 0 : i32
    return %c0_i32, %c0_i32_0 : i32, i32
  }
  func.func @transform_3(%arg0: i32, %arg1: i32) -> (i32, i32) {
    %c0_i32 = arith.constant 0 : i32
    %c0_i32_0 = arith.constant 0 : i32
    return %arg1, %c0_i32 : i32, i32
  }
  func.func @transform_4(%arg0: i32, %arg1: i32) -> (i32, i32, i32) {
    %c0_i32 = arith.constant 0 : i32
    %c0_i32_0 = arith.constant 0 : i32
    %c0_i32_1 = arith.constant 0 : i32
    return %arg0, %c0_i32, %c0_i32_0 : i32, i32, i32
  }
  func.func @transform_5(%arg0: i32, %arg1: i32) -> (i32, i32, i32) {
    %c0_i32 = arith.constant 0 : i32
    %c0_i32_0 = arith.constant 0 : i32
    %c0_i32_1 = arith.constant 0 : i32
    return %arg0, %c0_i32, %c0_i32_0 : i32, i32, i32
  }
  func.func @transform_6(%arg0: i32, %arg1: i32) -> (i32, i32, i32) {
    %c0_i32 = arith.constant 0 : i32
    %c0_i32_0 = arith.constant 0 : i32
    %c0_i32_1 = arith.constant 0 : i32
    return %arg0, %c0_i32, %c0_i32_0 : i32, i32, i32
  }
  func.func @transform_7(%arg0: i32, %arg1: i32) -> (i32, i32, i32) {
    %c0_i32 = arith.constant 0 : i32
    %c0_i32_0 = arith.constant 0 : i32
    %c0_i32_1 = arith.constant 0 : i32
    return %arg0, %c0_i32, %c0_i32_0 : i32, i32, i32
  }
  func.func @transform_8(%arg0: i32, %arg1: i32) -> (i32, i32, i32) {
    %c0_i32 = arith.constant 0 : i32
    %c0_i32_0 = arith.constant 0 : i32
    %c0_i32_1 = arith.constant 0 : i32
    return %arg0, %c0_i32, %c0_i32_0 : i32, i32, i32
  }
  func.func @transform_9(%arg0: i32, %arg1: i32) -> (i32, i32, i32) {
    %c0_i32 = arith.constant 0 : i32
    %c0_i32_0 = arith.constant 0 : i32
    %c0_i32_1 = arith.constant 0 : i32
    return %arg0, %c0_i32, %c0_i32_0 : i32, i32, i32
  }
  func.func @transform_10(%arg0: i32, %arg1: i32) -> (i32, i32, i32) {
    %c0_i32 = arith.constant 0 : i32
    %c0_i32_0 = arith.constant 0 : i32
    %c0_i32_1 = arith.constant 0 : i32
    return %arg0, %c0_i32, %c0_i32_0 : i32, i32, i32
  }
  func.func @transform_11(%arg0: i32, %arg1: i32) -> (i32, i32, i32) {
    %c0_i32 = arith.constant 0 : i32
    %c0_i32_0 = arith.constant 0 : i32
    %c0_i32_1 = arith.constant 0 : i32
    return %arg0, %c0_i32, %c0_i32_0 : i32, i32, i32
  }
  func.func @transform_12(%arg0: i32, %arg1: i32) -> (i32, i32, i32) {
    %c0_i32 = arith.constant 0 : i32
    %c0_i32_0 = arith.constant 0 : i32
    %c0_i32_1 = arith.constant 0 : i32
    return %arg0, %c0_i32, %c0_i32_0 : i32, i32, i32
  }
  func.func @transform_13(%arg0: i32, %arg1: i32) -> (i32, i32, i32) {
    %c0_i32 = arith.constant 0 : i32
    %c0_i32_0 = arith.constant 0 : i32
    %c0_i32_1 = arith.constant 0 : i32
    return %arg0, %c0_i32, %c0_i32_0 : i32, i32, i32
  }
  func.func @transform_14(%arg0: i32, %arg1: i32) -> (i32, i32, i32) {
    %c0_i32 = arith.constant 0 : i32
    %c0_i32_0 = arith.constant 0 : i32
    %c0_i32_1 = arith.constant 0 : i32
    return %arg0, %c0_i32, %c0_i32_0 : i32, i32, i32
  }
  func.func @transform_15(%arg0: i32, %arg1: i32) -> (i32, i32) {
    %c0_i32 = arith.constant 0 : i32
    %c0_i32_0 = arith.constant 0 : i32
    %c0_i32_1 = arith.constant 0 : i32
    return %c0_i32, %c0_i32_0 : i32, i32
  }
  func.func @transform_16(%arg0: i32, %arg1: i32) -> (i32, i32) {
    %c0_i32 = arith.constant 0 : i32
    %c0_i32_0 = arith.constant 0 : i32
    return %arg1, %c0_i32 : i32, i32
  }
}

</mosaic_0001>

<bundles_post_ra>
// kernel: tpu_custom_call.1
= control target key start
LH: loop header
LB: loop body
LE: loop exit
PB: predicated region body
PF: predicated region fallthrough
CT: control target
= control target key end

     0   :  { %s2730_s0 = inlined_call_operand.vmem [shape: s32[16,1], index: 0, kind: input, shape index: {}]   ;;  %s2731_s1 = inlined_call_operand.vmem [shape: s32[16,1], index: 1, kind: input, shape index: {}]   ;;  %s2732_s2 = inlined_call_operand.vmem [shape: f32[8,64], index: 2, kind: input, shape index: {}]   ;;  %s2733_s3 = inlined_call_operand.vmem [shape: f32[16,64], index: 3, kind: input, shape index: {}]   ;;  %s2734_s4 = inlined_call_operand.vmem [shape: f32[2,64,32], index: 4, kind: input, shape index: {}]   ;;  %s2735_s5 = inlined_call_operand.vmem [shape: f32[2,64,32], index: 5, kind: input, shape index: {}]   ;;  %s2736_s6 = inlined_call_operand.vmem [shape: f32[2,64,32], index: 6, kind: input, shape index: {}]   ;;  %s2737_s7 = inlined_call_operand.vmem [shape: f32[2,1,32], index: 7, kind: input, shape index: {}]   ;;  %s2738_s8 = inlined_call_operand.vmem [shape: f32[2,32,64], index: 8, kind: input, shape index: {}]   ;;  %s2739_s9 = inlined_call_operand.vmem [shape: f32[2,1,64], index: 9, kind: input, shape index: {}]   ;;  %s2740_s10 = inlined_call_operand.vmem [shape: f32[2,64,32], index: 10, kind: input, shape index: {}]   ;;  %s2741_s11 = inlined_call_operand.vmem [shape: f32[2,64,32], index: 11, kind: input, shape index: {}]   ;;  %s2742_s12 = inlined_call_operand.vmem [shape: f32[2,1,32], index: 12, kind: input, shape index: {}]   ;;  %s2743_s13 = inlined_call_operand.vmem [shape: f32[2,32,64], index: 13, kind: input, shape index: {}]   ;;  %s2744_s14 = inlined_call_operand.vmem [shape: f32[2,1,64], index: 14, kind: input, shape index: {}]   ;;  %s2745_s15 = inlined_call_operand.hbm [shape: f32[8,64], index: 15, kind: output, shape index: {0}]   ;;  %s2746_s16 = inlined_call_operand.hbm [shape: f32[16,64], index: 16, kind: output, shape index: {1}]  }
   0x1   :  { %2751 = sst [smem:[#allocation14_spill]] %s2730_s0 }
   0x2   :  { %2752 = sst [smem:[#allocation15_spill]] %s2731_s1 }
   0x3   :  { %2753 = sst [smem:[#allocation16_spill]] %s2734_s4 }
   0x4   :  { %2754 = sst [smem:[#allocation17_spill]] %s2735_s5 }
   0x5   :  { %2755 = sst [smem:[#allocation18_spill]] %s2736_s6 }
   0x6   :  { %2756 = sst [smem:[#allocation19_spill]] %s2737_s7 }
   0x7   :  { %2757 = sst [smem:[#allocation20_spill]] %s2738_s8 }
   0x8   :  { %2758 = sst [smem:[#allocation21_spill]] %s2745_s15 }
   0x9   :  { %2759 = sst [smem:[#allocation22_spill]] %s2746_s16 }
   0xa   :  { %22 = vsyncpa [#allocation6], 0 }
   0xb   :  { %23 = vsyncpa [#allocation8], 0  ;;  %s2457_s21 = smov 0   ;;  %s2459_s22 = smov 0  }
   0xc   :  { %s2461_s23 = smov 0  }
   0xd LB: > { %2760 = sst [smem:[#allocation11_spill]] %s2359_s22  ;;  %s41_s25 = sadd.s32 1, %s2359_s22  ;;  %s2363_s23 = sphi %s2461_s23, %s29_s23   ;;  %s2359_s22 = sphi %s2459_s22, %s2780_s22   ;;  %s2355_s21 = sphi %s2457_s21, %s2779_s21  }
   0xe   : > { %2761 = sst [smem:[#allocation12_spill]] %s2363_s23  ;;  %p43_p0 = scmp.ge.s32.totalorder %s41_s25, 2 }
   0xf   : > { %p1983_p1 = scmp.ge.s32.totalorder %s2363_s23, 1  ;;  %p599_p2 = scmp.lt.s32.totalorder %s2363_s23, 3 }
  0x10   : > { %s2782_s25 = smov (%p43_p0, %s41_s25), 0 }
  0x11   : > { %2762 = sst [smem:[#allocation13_spill]] %s2782_s25  ;;  %p600_p3 = pnand %p1983_p1, %p599_p2 }
  0x12   : > { %p719_p4 = scmp.lt.s32.totalorder (!%p600_p3), %s2355_s21, 1  ;;  %p768_p5 = scmp.eq.s32.totalorder (!%p600_p3), %s2355_s21, 0 }
  0x13   : > { %603 = sbr.rel (%p600_p3) target bundleno = 1405 (0x57d), region = 80  ;;  %s2764_s4 = sld [smem:[#allocation16_spill]] (!%p600_p3) }
  0x14   : > { %s2765_s5 = sld [smem:[#allocation17_spill]] (!%p600_p3) }
  0x15   : > { %s2766_s6 = sld [smem:[#allocation18_spill]] (!%p600_p3) }
  0x16   : > { %s2767_s8 = sld [smem:[#allocation20_spill]] (!%p600_p3) }
  0x18   : > { %s2481_s26 = scalar_select %p719_p4, %s2355_s21, 1  ;;  %v774_v0 = vld [vmem:[%s2732_s2] sm:$0xff] (%p768_p5)  ;;  %vm775_vm0 = vcmask (%p768_p5), 523264  }
  0x19   : > { %776 = vst.msk [vmem:[#allocation2] sm:$0xff] (%p768_p5), %vm775_vm0, %v774_v0 }
  0x1a   : > { %s2030_s27 = sshll.u32 %s2481_s26, 6  ;;  %s2033_s16 = sshll.u32 %s2481_s26, 5 }
  0x1b   : > { %s2491_s18 = scalar_lea.vmem %s2764_s4, %s2030_s27  ;;  %s2496_s24 = scalar_lea.vmem %s2765_s5, %s2030_s27 }
  0x1c   : > { %s2501_s15 = scalar_lea.vmem %s2766_s6, %s2030_s27  ;;  %s2507_s28 = scalar_lea.vmem %s2767_s8, %s2033_s16 }
  0x1d   : > { %s744_s17 = scalar_lea.vmem %s2739_s9, %s2481_s26  ;;  %s2516_s19 = scalar_lea.vmem %s2740_s10, %s2030_s27 }
  0x1e   : > { %s2521_s22 = scalar_lea.vmem %s2741_s11, %s2030_s27  ;;  %s757_s1 = scalar_lea.vmem %s2742_s12, %s2481_s26 }
  0x1f   : > { %s2530_s7 = scalar_lea.vmem %s2743_s13, %s2033_s16  ;;  %s765_s4 = scalar_lea.vmem %s2744_s14, %s2481_s26 }
  0x20   : > { %773 = sbr.rel (!%p768_p5) target bundleno = 37 (0x25), region = 84 }
  0x25 PF: > { %p1999_p6 = scmp.ne.s32.totalorder %s2355_s21, 0 }
  0x27   : > { %779 = sbr.rel (%p1999_p6) target bundleno = 46 (0x2e), region = 88 }
  0x2c   : > { %v780_v1 = vld [vmem:[%s2733_s3] sm:$0xff]  ;;  %vm783_vm1 = vcmask 523264   ;;  %v781_v2 = vld [vmem:[%s2733_s3 + $0x8] sm:$0xff] }
  0x2d   : > { %784 = vst.msk [vmem:[#allocation3] sm:$0xff] %vm783_vm1, %v780_v1  ;;  %785 = vst.msk [vmem:[#allocation3 + $0x8] sm:$0xff] %vm783_vm1, %v781_v2 }
  0x2e PF: > { %s2768_s23 = sld [smem:[#allocation14_spill]]  ;;  %v2365_v5 = vmov 0   ;;  %v2554_v6 = vld [vmem:[#allocation2] sm:$0xff]  ;;  %v1003_v9 = vld [vmem:[%s2496_s24 + $0x38] sm:$0xff]  ;;  %v795_v11 = vlaneseq  ;;  %vm825_vm2 = vcmask 64512   ;;  %v2366_v15 = vmov 0.0  }
  0x2f   : > { %s2770_s30 = sld [smem:[#allocation15_spill]]  ;;  %2283 = vset.pattern.permute.xlu0 %v2365_v5  ;;  %2284 = vset.pattern.permute.xlu1 %v2365_v5  ;;  %v995_v10 = vld [vmem:[%s2491_s18 + $0x38] sm:$0xff]  ;;  %v1002_v22 = vld [vmem:[%s2496_s24 + $0x30] sm:$0xff]  ;;  %v1001_v24 = vld [vmem:[%s2496_s24 + $0x28] sm:$0xff]  ;;  %vm789_vm7 = vcmask 523264   ;;  %vm1280_vm8 = vcmask 261120  }
  0x30   : > { %2106 = vmatprep.subr.mxu0 %v2554_v6  ;;  %2111 = vmatprep.subr.mxu1 %v2554_v6  ;;  %v796_v12 = vand.u32 127, %v795_v11  ;;  %v994_v23 = vld [vmem:[%s2491_s18 + $0x30] sm:$0xff]  ;;  %v993_v25 = vld [vmem:[%s2491_s18 + $0x28] sm:$0xff]  ;;  %v1000_v26 = vld [vmem:[%s2496_s24 + $0x20] sm:$0xff]  ;;  %790 = vst.msk [vmem:[#allocation4] sm:$0xff] %vm789_vm7, %v2366_v15  ;;  %vm2367_vm9 = vmmov 0  }
  0x31   : > { %2107 = vmatpush3.msra.mxu0 %v2554_v6  ;;  %2112 = vmatpush3.msra.mxu1 %v2554_v6  ;;  %v992_v27 = vld [vmem:[%s2491_s18 + $0x20] sm:$0xff]  ;;  %v999_v28 = vld [vmem:[%s2496_s24 + $0x18] sm:$0xff]  ;;  %v998_v30 = vld [vmem:[%s2496_s24 + $0x10] sm:$0xff]  ;;  %vm1399_vm10 = vcmask 130048  }
  0x32   : > { %2116 = vmatprep.subr.mxu0 %v1003_v9  ;;  %2135 = vmatprep.subr.mxu1 %v995_v10  ;;  %v991_v29 = vld [vmem:[%s2491_s18 + $0x18] sm:$0xff]  ;;  %v990_v31 = vld [vmem:[%s2491_s18 + $0x10] sm:$0xff]  ;;  %v997_v32 = vld [vmem:[%s2496_s24 + $0x8] sm:$0xff] }
  0x33   : > { %v989_v33 = vld [vmem:[%s2491_s18 + $0x8] sm:$0xff]  ;;  %v996_v34 = vld [vmem:[%s2496_s24] sm:$0xff]  ;;  %v1174_v37 = vld [vmem:[%s2501_s15 + $0x38] sm:$0xff] }
  0x34   : > { %s2769_s29 = smov %s2768_s23  ;;  %v797_v3 = vld [vmem:[%s2768_s23] sm:$0xff]  ;;  %v793_v36 = vld [vmem:[#allocation3] sm:$0xff]  ;;  %v794_v38 = vld [vmem:[#allocation3 + $0x8] sm:$0xff] }
  0x35   : > { %v811_v4 = vld [vmem:[%s2770_s30] sm:$0xff]  ;;  %800 = vperm.xlu0 %2283, %v797_v3   ;;  %v798_v7 = vld [vmem:[%s2769_s29 + $0x8] sm:$0xff]  ;;  %v1173_v43 = vld [vmem:[%s2501_s15 + $0x30] sm:$0xff] }
  0x36   : > { %814 = vperm.xlu1 %2284, %v811_v4   ;;  %v812_v8 = vld [vmem:[%s2770_s30 + $0x8] sm:$0xff]  ;;  %v988_v35 = vld [vmem:[%s2491_s18] sm:$0xff]  ;;  %v1170_v46 = vld [vmem:[%s2501_s15 + $0x18] sm:$0xff]  ;;  %s2771_s18 = sld [smem:[#allocation19_spill]] }
  0x37   : > { %v1172_v44 = vld [vmem:[%s2501_s15 + $0x28] sm:$0xff]  ;;  %v1171_v45 = vld [vmem:[%s2501_s15 + $0x20] sm:$0xff]  ;;  %v1169_v47 = vld [vmem:[%s2501_s15 + $0x10] sm:$0xff] }
  0x38   : > { %v1168_v48 = vld [vmem:[%s2501_s15 + $0x8] sm:$0xff]  ;;  %v1167_v49 = vld [vmem:[%s2501_s15] sm:$0xff]  ;;  %v1272_v50 = vld [vmem:[%s2507_s28 + $0x18] sm:$0xff] }
  0x39   : > { %803 = vperm.xlu0 %2283, %v798_v7   ;;  %v1271_v51 = vld [vmem:[%s2507_s28 + $0x10] sm:$0xff]  ;;  %v1270_v52 = vld [vmem:[%s2507_s28 + $0x8] sm:$0xff]  ;;  %v1269_v53 = vld [vmem:[%s2507_s28] sm:$0xff] }
  0x3a   : > { %817 = vperm.xlu1 %2284, %v812_v8   ;;  %v1486_v5 = vld [vmem:[%s2516_s19 + $0x38] sm:$0xff]  ;;  %v1485_v7 = vld [vmem:[%s2516_s19 + $0x30] sm:$0xff]  ;;  %v1484_v8 = vld [vmem:[%s2516_s19 + $0x28] sm:$0xff] }
  0x3c   : > { %s2772_s27 = scalar_lea.vmem %s2771_s18, %s2481_s26 }
  0x3d   : > { %v2014_v62 = vld [vmem:[%s2772_s27] ss:$0 sm:$0xff] }
  0xb0   : > { %v801_v13 = vpop.permute.xlu0 %800 }
  0xb1   : > { %v815_v14 = vpop.permute.xlu1 %814  ;;  %vm805_vm3 = vcmp.eq.s32.totalorder %v796_v12, %v801_v13 }
  0xb2   : > { %vm819_vm4 = vcmp.eq.s32.totalorder %v796_v12, %v815_v14  ;;  %v2000_v16 = vsel %vm805_vm3, 1.0, %v2366_v15 }
  0xb3   : > { %v2002_v17 = vsel %vm819_vm4, 1.0, %v2366_v15  ;;  %2108 = vmatprep.mubr.msk.f32.mxu0 %vm825_vm2, %v2000_v16  ;;  %v1494_v16 = vld [vmem:[%s2521_s22 + $0x38] sm:$0xff] }
  0xb4   : > { %1367 = vxpose.xlu0.b32.start [1/2] (short) (narrow) %v2002_v17, 8  ;;  %v804_v18 = vpop.permute.xlu0 %803  ;;  %2113 = vmatprep.mubr.msk.f32.mxu1 %vm825_vm2, %v2002_v17  ;;  %v1493_v17 = vld [vmem:[%s2521_s22 + $0x30] sm:$0xff] }
  0xb5   : > { %v818_v19 = vpop.permute.xlu1 %817  ;;  %vm806_vm5 = vcmp.eq.s32.totalorder %v796_v12, %v804_v18  ;;  %v1492_v18 = vld [vmem:[%s2521_s22 + $0x28] sm:$0xff] }
  0xb6   : > { %vm820_vm6 = vcmp.eq.s32.totalorder %v796_v12, %v818_v19  ;;  %v2001_v20 = vsel %vm806_vm5, 1.0, %v2366_v15  ;;  %v1483_v19 = vld [vmem:[%s2516_s19 + $0x20] sm:$0xff] }
  0xb7   : > { %v2003_v21 = vsel %vm820_vm6, 1.0, %v2366_v15  ;;  %2109 = vmatmul.mubr.msk.f32.vlgmr.msra.gmra.mxu0 %vm825_vm2, %v2001_v20  ;;  %v1491_v20 = vld [vmem:[%s2521_s22 + $0x20] sm:$0xff] }
  0xb8   : > { %2114 = vmatmul.mubr.msk.f32.vlgmr.msra.gmra.mxu1 %vm825_vm2, %v2003_v21  ;;  %1368 = vxpose.xlu0.b32.end [2/2] (short) (narrow) %v2003_v21, 8  ;;  %v1482_v21 = vld [vmem:[%s2516_s19 + $0x18] sm:$0xff] }
  0xb9   : > { %2117 = vmatpush3.msra.mxu0 %v1003_v9  ;;  %2136 = vmatpush3.msra.mxu1 %v995_v10  ;;  %v2015_v9 = vld [vmem:[%s744_s17] ss:$0 sm:$0xff]  ;;  %s2773_s17 = sld [smem:[#allocation12_spill]] }
  0xba   : > { %2118 = vmatprep.subr.mxu0 %v1002_v22  ;;  %2137 = vmatprep.subr.mxu1 %v994_v23 }
  0xbb   : > { %2119 = vmatpush3.msra.mxu0 %v1002_v22  ;;  %2138 = vmatpush3.msra.mxu1 %v994_v23  ;;  %v1490_v22 = vld [vmem:[%s2521_s22 + $0x18] sm:$0xff]  ;;  %v1481_v23 = vld [vmem:[%s2516_s19 + $0x10] sm:$0xff] }
  0xbc   : > { %2120 = vmatprep.subr.mxu0 %v1001_v24  ;;  %2139 = vmatprep.subr.mxu1 %v993_v25 }
  0xbd   : > { %2121 = vmatpush3.msra.mxu0 %v1001_v24  ;;  %2140 = vmatpush3.msra.mxu1 %v993_v25  ;;  %v1489_v24 = vld [vmem:[%s2521_s22 + $0x10] sm:$0xff]  ;;  %v1480_v25 = vld [vmem:[%s2516_s19 + $0x8] sm:$0xff] }
  0xbe   : > { %2122 = vmatprep.subr.mxu0 %v1000_v26  ;;  %2141 = vmatprep.subr.mxu1 %v992_v27 }
  0xbf   : > { %2123 = vmatpush3.msra.mxu0 %v1000_v26  ;;  %2142 = vmatpush3.msra.mxu1 %v992_v27  ;;  %v1488_v26 = vld [vmem:[%s2521_s22 + $0x8] sm:$0xff]  ;;  %v1479_v27 = vld [vmem:[%s2516_s19] sm:$0xff]  ;;  %s2774_s25 = sadd.s32 4294967295, %s2773_s17  }
  0xc0   : > { %2124 = vmatprep.subr.mxu0 %v999_v28  ;;  %2143 = vmatprep.subr.mxu1 %v991_v29  ;;  %p2688_p7 = scmp.eq.s32.totalorder %s2774_s25, 1 }
  0xc1   : > { %2125 = vmatpush3.msra.mxu0 %v999_v28  ;;  %2144 = vmatpush3.msra.mxu1 %v991_v29  ;;  %v1487_v28 = vld [vmem:[%s2521_s22] sm:$0xff]  ;;  %v1366_v29 = vld [vmem:[#allocation4] sm:$0xff] }
  0xc2   : > { %2126 = vmatprep.subr.mxu0 %v998_v30  ;;  %2145 = vmatprep.subr.mxu1 %v990_v31 }
  0xc3   : > { %2127 = vmatpush3.msra.mxu0 %v998_v30  ;;  %2146 = vmatpush3.msra.mxu1 %v990_v31 }
  0xc4   : > { %2128 = vmatprep.subr.mxu0 %v997_v32  ;;  %2147 = vmatprep.subr.mxu1 %v989_v33 }
  0xc5   : > { %2129 = vmatpush3.msra.mxu0 %v997_v32  ;;  %2148 = vmatpush3.msra.mxu1 %v989_v33 }
  0xc6   : > { %2130 = vmatprep.subr.mxu0 %v996_v34  ;;  %2149 = vmatprep.subr.mxu1 %v988_v35 }
  0xc7   : > { %2131 = vmatpush3.msra.mxu0 %v996_v34  ;;  %2150 = vmatpush3.msra.mxu1 %v988_v35  ;;  %v1653_v34 = vld [vmem:[%s2530_s7 + $0x18] sm:$0xff] }
  0xc8   : > { %2151 = vmatprep.mubr.msk.f32.mxu1 %vm789_vm7, %v793_v36  ;;  %2154 = vmatprep.subr.mxu0 %v1174_v37  ;;  %v1652_v36 = vld [vmem:[%s2530_s7 + $0x10] sm:$0xff] }
  0xc9   : > { %2152 = vmatmul.mubr.msk.f32.vlgmr.msra.gmra.mxu1 %vm789_vm7, %v794_v38  ;;  %2173 = vmatprep.subr.mxu1 %v1272_v50  ;;  %v1650_v38 = vld [vmem:[%s2530_s7] sm:$0xff] }
  0xca   : > { %2174 = vmatpush3.msra.mxu1 %v1272_v50 }
  0xcb   : > { %2175 = vmatprep.subr.mxu1 %v1271_v51 }
  0xcc   : > { %2176 = vmatpush3.msra.mxu1 %v1271_v51 }
  0xcd   : > { %2177 = vmatprep.subr.mxu1 %v1270_v52 }
  0xce   : > { %2178 = vmatpush3.msra.mxu1 %v1270_v52 }
  0xcf   : > { %2179 = vmatprep.subr.mxu1 %v1269_v53 }
  0xd0   : > { %2180 = vmatpush3.msra.mxu1 %v1269_v53 }
  0xd1   : > { %2184 = vmatprep.subr.mxu1 %v2366_v15 }
 0x130   : > { %v1383_v14 = vpop.trf.xlu0 }
 0x177   : > { %v2110_v39 = vpop.f32.mrf.mxu0 }
 0x178   : > { %v2115_v40 = vpop.f32.mrf.mxu1 }
 0x179   : > { %v898_v41 = vpop.f32.mrf.mxu0 }
 0x17a   : > { %v979_v42 = vpop.f32.mrf.mxu1  ;;  %2132 = vmatprep.mubr.msk.f32.mxu0 %vm789_vm7, %v898_v41 }
 0x17b   : > { %2133 = vmatmul.mubr.msk.f32.vlgmr.msra.gmra.mxu0 %vm789_vm7, %v2110_v39 }
 0x17c   : > { %2155 = vmatpush3.msra.mxu0 %v1174_v37  ;;  %2170 = vmatprep.mubr.msk.f32.mxu0 %vm789_vm7, %v979_v42  ;;  %v1651_v37 = vld [vmem:[%s2530_s7 + $0x8] sm:$0xff]  ;;  %s2368_s7 = smov [#allocation7]  }
 0x17d   : > { %2156 = vmatprep.subr.mxu0 %v1173_v43  ;;  %s1756_s21 = sshll.u32 %s2368_s7, 4  ;;  %s1757_s21 = int_to_ptr.vmem [resolvable:$true] %s1756_s21 }
 0x17e   : > { %2157 = vmatpush3.msra.mxu0 %v1173_v43  ;;  %s2285_s0 = scalar_lea.vmem %s1757_s21, 256  ;;  %p2292_p11 = scmp.lt.s32.totalorder %s1757_s21, %s1757_s21 }
 0x17f   : > { %2158 = vmatprep.subr.mxu0 %v1172_v44  ;;  %p2286_p8 = scmp.ne.s32.totalorder %s1757_s21, %s2285_s0  ;;  %p2293_p12 = scmp.lt.s32.totalorder %s2285_s0, %s2285_s0 }
 0x180   : > { %2159 = vmatpush3.msra.mxu0 %v1172_v44 }
 0x181   : > { %2160 = vmatprep.subr.mxu0 %v1171_v45  ;;  %p2287_p9 = pnand %p2286_p8, %p2688_p7  ;;  %p2294_p13 = por %p2293_p12, %p2292_p11 }
 0x182   : > { %2161 = vmatpush3.msra.mxu0 %v1171_v45 }
 0x183   : > { %2162 = vmatprep.subr.mxu0 %v1170_v46  ;;  %p2288_p10 = pneg %p2287_p9 }
 0x184   : > { %2163 = vmatpush3.msra.mxu0 %v1170_v46 }
 0x185   : > { %2164 = vmatprep.subr.mxu0 %v1169_v47  ;;  %p2295_p0 = pnand %p2294_p13, %p2288_p10 }
 0x186   : > { %2165 = vmatpush3.msra.mxu0 %v1169_v47 }
 0x187   : > { %2166 = vmatprep.subr.mxu0 %v1168_v48 }
 0x188   : > { %2167 = vmatpush3.msra.mxu0 %v1168_v48 }
 0x189   : > { %2168 = vmatprep.subr.mxu0 %v1167_v49  ;;  %v2153_v55 = vpop.f32.mrf.mxu1 }
 0x18a   : > { %2169 = vmatpush3.msra.mxu0 %v1167_v49 }
 0x18b   : > { %2171 = vmatmul.mubr.msk.f32.vlgmr.msra.gmra.mxu0 %vm789_vm7, %v2115_v40  ;;  %2210 = vmatprep.subr.mxu0 %v2366_v15  ;;  %v1158_v57 = vpop.f32.mrf.mxu1  ;;  %v2021_v40 = vld [vmem:[%s757_s1] ss:$0 sm:$0xff] }
 0x18c   : > { %2226 = vmatprep.mubr.msk.f32.mxu0 %vm2367_vm9, %v2366_v15  ;;  %2211 = vmatpush3.msra.mxu0 %v1486_v5 }
 0x18d   : > { %2212 = vmatprep.subr.mxu0 %v2366_v15 }
 0x18e   : > { %2213 = vmatpush3.msra.mxu0 %v1485_v7 }
 0x18f   : > { %2214 = vmatprep.subr.mxu0 %v2366_v15 }
 0x190   : > { %2215 = vmatpush3.msra.mxu0 %v1484_v8 }
 0x191   : > { %2216 = vmatprep.subr.mxu0 %v2366_v15 }
 0x192   : > { %2217 = vmatpush3.msra.mxu0 %v1483_v19 }
 0x193   : > { %2218 = vmatprep.subr.mxu0 %v2366_v15 }
 0x194   : > { %2219 = vmatpush3.msra.mxu0 %v1482_v21 }
 0x195   : > { %2220 = vmatprep.subr.mxu0 %v2366_v15 }
 0x196   : > { %2221 = vmatpush3.msra.mxu0 %v1481_v23 }
 0x197   : > { %2222 = vmatprep.subr.mxu0 %v2366_v15 }
 0x198   : > { %2223 = vmatpush3.msra.mxu0 %v1480_v25 }
 0x199   : > { %2224 = vmatprep.subr.mxu0 %v2366_v15 }
 0x19a   : > { %2225 = vmatpush3.msra.mxu0 %v1479_v27 }
 0x19b   : > { %2227 = vmatmul.mubr.msk.f32.vlgmr.msra.gmra.mxu0 %vm789_vm7, %v2554_v6 }
 0x23b   : > { %v2134_v54 = vpop.f32.mrf.mxu0 }
 0x23c   : > { %v1164_v58 = vadd.f32 %v2153_v55, %v2134_v54 }
 0x23d   : > { %v1077_v56 = vpop.f32.mrf.mxu0 }
 0x23e   : > { %v1159_v60 = vadd.f32 %v1158_v57, %v1077_v56 }
 0x24b   : > { %v2172_v59 = vpop.f32.mrf.mxu0 }
 0x24c   : > { %v1257_v61 = vadd.f32 %v2172_v59, %v1164_v58 }
 0x24d   : > { %v1247_v63 = vpop.f32.mrf.mxu0 }
 0x24e   : > { %v1256_v0 = vadd.f32 %v1247_v63, %v1159_v60  ;;  %v1266_v1 = vadd.f32 %v2014_v62, %v1257_v61 }
 0x250   : > { %v1265_v2 = vadd.f32 %v2014_v62, %v1256_v0  ;;  %v1268_v4 = vmax.f32 %v1266_v1, 0.0 }
 0x252   : > { %v1267_v3 = vmax.f32 %v1265_v2, 0.0 }
 0x254   : > { %2181 = vmatprep.mubr.msk.f32.mxu1 %vm1280_vm8, %v1267_v3 }
 0x255   : > { %2182 = vmatmul.mubr.msk.f32.vlgmr.msra.gmra.mxu1 %vm1280_vm8, %v1268_v4 }
 0x256   : > { %2188 = vmatprep.mubr.msk.f32.mxu1 %vm2367_vm9, %v2366_v15 }
 0x25b   : > { %v1637_v6 = vpop.f32.mrf.mxu0 }
 0x25d   : > { %v2228_v35 = vpop.f32.mrf.mxu0 }
 0x315   : > { %v2183_v10 = vpop.f32.mrf.mxu1 }
 0x316   : > { %v1359_v11 = vadd.f32 %v2183_v10, %v2015_v9 }
 0x317   : > { %v1353_v12 = vpop.f32.mrf.mxu1 }
 0x318   : > { %1363 = vst.msk [vmem:[#allocation3 + $0x8] sm:$0xff] %vm789_vm7, %v1359_v11  ;;  %1365 = vst.msk [vmem:[#allocation7 + $0x8] sm:$0xff] %vm789_vm7, %v1359_v11  ;;  %v1354_v13 = vadd.f32 %v2015_v9, %v1353_v12  ;;  %2185 = vmatpush3.msra.mxu1 %v1359_v11 }
 0x319   : > { %2186 = vmatprep.subr.mxu1 %v2366_v15 }
 0x31a   : > { %1362 = vst.msk [vmem:[#allocation3] sm:$0xff] %vm789_vm7, %v1354_v13  ;;  %1364 = vst.msk [vmem:[#allocation7] sm:$0xff] %vm789_vm7, %v1354_v13  ;;  %2187 = vmatpush3.msra.mxu1 %v1354_v13 }
 0x31b   : > { %2189 = vmatmul.mubr.msk.f32.vlgmr.msra.gmra.mxu1 %vm1399_vm10, %v1383_v14  ;;  %2191 = vmatprep.subr.mxu1 %v2366_v15 }
 0x31c   : > { %2192 = vmatpush3.msra.mxu1 %v1494_v16  ;;  %2207 = vmatprep.mubr.msk.f32.mxu1 %vm2367_vm9, %v2366_v15 }
 0x31d   : > { %2193 = vmatprep.subr.mxu1 %v2366_v15 }
 0x31e   : > { %2194 = vmatpush3.msra.mxu1 %v1493_v17 }
 0x31f   : > { %2195 = vmatprep.subr.mxu1 %v2366_v15 }
 0x320   : > { %2196 = vmatpush3.msra.mxu1 %v1492_v18 }
 0x321   : > { %2197 = vmatprep.subr.mxu1 %v2366_v15 }
 0x322   : > { %2198 = vmatpush3.msra.mxu1 %v1491_v20 }
 0x323   : > { %2199 = vmatprep.subr.mxu1 %v2366_v15 }
 0x324   : > { %2200 = vmatpush3.msra.mxu1 %v1490_v22 }
 0x325   : > { %2201 = vmatprep.subr.mxu1 %v2366_v15 }
 0x326   : > { %2202 = vmatpush3.msra.mxu1 %v1489_v24 }
 0x327   : > { %2203 = vmatprep.subr.mxu1 %v2366_v15 }
 0x328   : > { %2204 = vmatpush3.msra.mxu1 %v1488_v26 }
 0x329   : > { %2205 = vmatprep.subr.mxu1 %v2366_v15 }
 0x32a   : > { %2206 = vmatpush3.msra.mxu1 %v1487_v28 }
 0x32b   : > { %2229 = vmatprep.subr.mxu1 %v2366_v15 }
 0x3db   : > { %v1469_v30 = vpop.f32.mrf.mxu1 }
 0x3dc   : > { %v1473_v31 = vadd.f32 %v1469_v30, %v1366_v29 }
 0x3dd   : > { %v2190_v32 = vpop.f32.mrf.mxu1 }
 0x3de   : > { %1474 = vst.msk [vmem:[#allocation4] sm:$0xff] %vm789_vm7, %v1473_v31 }
 0x3e5   : > { %v1478_v33 = vld [vmem:[#allocation4] sm:$0xff] }
 0x3e6   : > { %2208 = vmatmul.mubr.msk.f32.vlgmr.msra.gmra.mxu1 %vm789_vm7, %v1478_v33 }
 0x3e7   : > { %2237 = vmatprep.mubr.msk.f32.mxu1 %vm2367_vm9, %v2366_v15  ;;  %2230 = vmatpush3.msra.mxu1 %v1653_v34 }
 0x3e8   : > { %2231 = vmatprep.subr.mxu1 %v2366_v15 }
 0x3e9   : > { %2232 = vmatpush3.msra.mxu1 %v1652_v36 }
 0x3ea   : > { %2233 = vmatprep.subr.mxu1 %v2366_v15 }
 0x3eb   : > { %2234 = vmatpush3.msra.mxu1 %v1651_v37 }
 0x3ec   : > { %2235 = vmatprep.subr.mxu1 %v2366_v15 }
 0x3ed   : > { %2236 = vmatpush3.msra.mxu1 %v1650_v38 }
 0x4a6   : > { %v1564_v39 = vpop.f32.mrf.mxu1 }
 0x4a7   : > { %v1638_v41 = vadd.f32 %v1637_v6, %v1564_v39 }
 0x4a8   : > { %v2209_v42 = vpop.f32.mrf.mxu1 }
 0x4a9   : > { %v1648_v43 = vadd.f32 %v2021_v40, %v1638_v41 }
 0x4ab   : > { %v1649_v44 = vmax.f32 %v1648_v43, 0.0 }
 0x4ad   : > { %2238 = vmatmul.mubr.msk.f32.vlgmr.msra.gmra.mxu1 %vm1280_vm8, %v1649_v44 }
 0x4ae   : > { %2298 = shalt.err (!%p2295_p0)
}
 0x4af   : > { %s2369_s1 = smov 128   ;;  %s2370_s5 = smov 8   ;;  %v2022_v15 = vld [vmem:[%s765_s4] ss:$0 sm:$0xff] }
 0x4b0   : > { %s2776_s16 = sld [smem:[#allocation22_spill]]  ;;  %s2371_s18 = smov [#allocation5]  }
 0x4b1   : > { %s1743_s27 = sshll.u32 %s2371_s18, 4  ;;  %s1744_s27 = int_to_ptr.vmem [resolvable:$true] %s1743_s27 }
 0x4b2   : > { %s2309_s28 = scalar_lea.vmem %s1744_s27, 128  ;;  %p2316_p4 = scmp.lt.s32.totalorder %s1744_s27, %s1744_s27 }
 0x4b3   : > { %p2310_p1 = scmp.ne.s32.totalorder %s1744_s27, %s2309_s28  ;;  %p2317_p5 = scmp.lt.s32.totalorder %s2309_s28, %s2309_s28 }
 0x4b5   : > { %p2311_p2 = pnand %p2310_p1, %p2688_p7  ;;  %p2318_p6 = por %p2317_p5, %p2316_p4 }
 0x4b6   : > { %2243 = dma.vmem_to_hbm [thread:$0]  (%p2688_p7), %s1757_s21, 256, %s2776_s16, [#allocation8], %s2369_s1, %s2369_s1, %s2370_s5  }
 0x4b7   : > { %p2312_p3 = pneg %p2311_p2 }
 0x4b9   : > { %p2319_p8 = pnand %p2318_p6, %p2312_p3 }
 0x56d   : > { %v1730_v45 = vpop.f32.mrf.mxu1 }
 0x56e   : > { %v1731_v46 = vadd.f32 %v2022_v15, %v1730_v45 }
 0x56f   : > { %v2239_v47 = vpop.f32.mrf.mxu1 }
 0x570   : > { %1734 = vst.msk [vmem:[#allocation2] sm:$0xff] %vm789_vm7, %v1731_v46  ;;  %1735 = vst.msk [vmem:[#allocation5] sm:$0xff] %vm789_vm7, %v1731_v46 }
 0x571   : > { %2322 = shalt.err (!%p2319_p8)
}
 0x572   : > { %s2777_s20 = sld [smem:[#allocation21_spill]] }
 0x578   : > { %2241 = dma.vmem_to_hbm [thread:$0]  (%p2688_p7), %s1744_s27, 128, %s2777_s20, [#allocation6]  }
 0x579   : > { %2346 = dma.done.wait (%p2688_p7), [#allocation6], 128  }
 0x57a   : > { %2348 = vsyncadd (%p2688_p7), [#allocation6], 4294967168 }
 0x57b   : > { %2350 = dma.done.wait (%p2688_p7), [#allocation8], 256  }
 0x57c   : > { %2352 = vsyncadd (%p2688_p7), [#allocation8], 4294967040 }
 0x57d PF: > { %s2778_s17 = sld [smem:[#allocation12_spill]] }
 0x57e   : > { %s2779_s21 = sld [smem:[#allocation11_spill]] }
 0x57f   : > { %s2780_s22 = sld [smem:[#allocation13_spill]] }
 0x583   : > { %s29_s23 = sadd.s32 1, %s2778_s17  }
 0x584   : > { %p26_p9 = scmp.ge.s32.totalorder %s29_s23, 4  }
 0x586   :  { %28 = sbr.rel (!%p26_p9) target bundleno = 13 (0xd), region = 173 }
 0x58b   :  { %1776 = vsyncpa [#allocation6], 1 }
 0x58c   :  { %1778 = vsyncpa [#allocation6 + $0x1], 1 }
 0x58d   :  { %1779 = vsyncpa [#allocation8], 1 }

</bundles_post_ra>
